<compile_context>
chip_gen: v5e
topology: v5e:2x2
jax: 0.10.0
libtpu: 0.0.40
codegen_flags: <defaults>
</compile_context>

<pallas_src>
import functools

import jax
import jax.numpy as jnp
from jax import lax
from jax.experimental import pallas as pl
from jax.experimental.pallas import tpu as pltpu

LANE = 128
SUBLANE = 8


def _round_up(a, m):
    return ((a + m - 1) // m) * m


def _pad2d(a, rows, cols):
    pr, pc = rows - a.shape[0], cols - a.shape[1]
    if pr == 0 and pc == 0:
        return a
    return jnp.pad(a, ((0, pr), (0, pc)))


def _lsm_kernel_direct(x_ref, w_ref, b_ref, o_ref, *, compute_dtype):
    # x: (tile_b, K), w: (tile_n, K) in PyTorch layout. Cast on the VPU (hidden
    # under the MXU/DMA), contract the trailing dims on the MXU (== x @ w.T)
    # with f32 accumulation, then bias + tanh on the lane-dense f32 tile.
    x = x_ref[...]
    w = w_ref[...]
    if x.dtype != compute_dtype:
        x = x.astype(compute_dtype)
    if w.dtype != compute_dtype:
        w = w.astype(compute_dtype)
    acc = lax.dot_general(x, w, (((1,), (1,)), ((), ())),
                          preferred_element_type=jnp.float32)
    o_ref[...] = jnp.tanh(acc + b_ref[...]).astype(o_ref.dtype)


def _lsm_kernel_ktiled(x_ref, w_ref, b_ref, o_ref, acc_ref, *, compute_dtype):
    # Same contraction but with the input_size axis tiled over the last
    # ("arbitrary") grid dimension; accumulate in an f32 VMEM scratch.
    k = pl.program_id(2)

    @pl.when(k == 0)
    def _():
        acc_ref[...] = jnp.zeros_like(acc_ref)

    x = x_ref[...]
    w = w_ref[...]
    if x.dtype != compute_dtype:
        x = x.astype(compute_dtype)
    if w.dtype != compute_dtype:
        w = w.astype(compute_dtype)
    acc_ref[...] += lax.dot_general(x, w, (((1,), (1,)), ((), ())),
                                    preferred_element_type=jnp.float32)

    @pl.when(k == pl.num_programs(2) - 1)
    def _():
        o_ref[...] = jnp.tanh(acc_ref[...] + b_ref[...]).astype(o_ref.dtype)


def liquid_state_machine(x, w, b, *, tile_b=None, tile_n=None, tile_k=None,
                         compute_dtype=jnp.bfloat16, out_dtype=jnp.float32):
    """y = tanh(x @ w.T + b).

    x: [B, I], w: [R, I] (PyTorch nn.Linear layout), b: [R]. Returns [B, R].
    Set compute_dtype=jnp.float32 for strict f32 parity with the PyTorch ref.
    """
    B, I = x.shape
    R, I2 = w.shape
    assert I == I2, "weight / input size mismatch"
    assert b.shape == (R,), "bias size mismatch"

    # ---- generation-aware VMEM budget --------------------------------------
    try:
        vmem_cap = int(pltpu.get_tpu_info().vmem_capacity_bytes)
    except Exception:  # interpret mode / older runtimes
        vmem_cap = 64 << 20
    budget = (vmem_cap * 3) // 4          # ~48 MiB on v7x, ~96 MiB on v5e/v6e

    xbytes = jnp.dtype(x.dtype).itemsize   # streamed in native dtype; cast in-kernel
    wbytes = jnp.dtype(w.dtype).itemsize
    obytes = jnp.dtype(out_dtype).itemsize

    def footprint(tb, tn, tk):
        # double-buffered x / W / bias / out tiles + f32 accumulator scratch
        return (2 * tb * tk * xbytes + 2 * tn * tk * wbytes
                + 2 * SUBLANE * tn * 4 + 2 * tb * tn * obytes + tb * tn * 4)

    # ---- tile selection -----------------------------------------------------
    big_vmem = budget >= (64 << 20)
    cap_n = 1024 if big_vmem else 512
    cap_b = 1024 if big_vmem else 512

    R_lane = _round_up(R, LANE)           # lane-dense output (unmasked vst)
    if tile_n is None:
        tile_n = min(R_lane, cap_n)
    tile_n = _round_up(min(tile_n, R_lane), LANE)

    if tile_b is None:
        # Minimize batch padding: the smallest sublane-multiple tile that still
        # needs the same number of batch tiles as the cap would.
        n_bt = max(1, -(-B // cap_b))
        tile_b = _round_up(-(-B // n_bt), SUBLANE)
    tile_b = _round_up(min(tile_b, _round_up(B, SUBLANE)), SUBLANE)

    # Decide whether the contraction (input_size) axis needs its own grid dim.
    if tile_k is None:
        if footprint(tile_b, tile_n, I) <= budget // 2:
            tile_k = I                      # full-K: no reduction grid axis
        else:
            tile_k = min(512, _round_up(I, LANE))
            while tile_k > LANE and footprint(tile_b, tile_n, tile_k) > budget // 2:
                tile_k //= 2
    k_tiled = tile_k != I
    if k_tiled:
        tile_k = _round_up(tile_k, LANE)

    # Last-resort shrink if the chosen tiles still overflow the budget.
    while footprint(tile_b, tile_n, tile_k) > budget:
        if tile_n > LANE:
            tile_n = _round_up(tile_n // 2, LANE)
        elif tile_b > SUBLANE:
            tile_b = _round_up(tile_b // 2, SUBLANE)
        else:
            break

    B_pad = _round_up(B, tile_b)
    R_pad = _round_up(R_lane, tile_n)
    K_pad = _round_up(I, tile_k) if k_tiled else I

    # Guarantee >= 2 steps on a *parallel* axis so both v7x TensorCores work.
    if (B_pad // tile_b) * (R_pad // tile_n) == 1:
        if tile_n >= 2 * LANE:
            tile_n //= 2
        elif tile_b >= 2 * SUBLANE:
            tile_b = _round_up(tile_b // 2, SUBLANE)
        B_pad = _round_up(B, tile_b)
        R_pad = _round_up(R_lane, tile_n)

    # ---- pad operands only when needed (zero pads -> outputs sliced away) ---
    x_p = _pad2d(x, B_pad, K_pad)
    w_p = _pad2d(w, R_pad, K_pad)                          # stays [R, I] layout
    b_p = _pad2d(b.astype(jnp.float32).reshape(1, R), 1, R_pad)

    vmem_limit = int(min(max(footprint(tile_b, tile_n, tile_k) + (8 << 20),
                             16 << 20), budget))

    cost = pl.CostEstimate(
        flops=2 * B_pad * K_pad * R_pad,
        transcendentals=B_pad * R_pad,
        bytes_accessed=(B_pad * K_pad * xbytes
                        + (B_pad // tile_b) * R_pad * K_pad * wbytes
                        + R_pad * 4 + B_pad * R_pad * obytes),
    )

    if k_tiled:
        grid = (B_pad // tile_b, R_pad // tile_n, K_pad // tile_k)
        in_specs = [
            pl.BlockSpec((tile_b, tile_k), lambda i, j, k: (i, k)),   # x tile
            pl.BlockSpec((tile_n, tile_k), lambda i, j, k: (j, k)),   # W tile
            pl.BlockSpec((1, tile_n), lambda i, j, k: (0, j)),        # bias
        ]
        out_specs = pl.BlockSpec((tile_b, tile_n), lambda i, j, k: (i, j))
        scratch = [pltpu.VMEM((tile_b, tile_n), jnp.float32)]
        kernel = functools.partial(_lsm_kernel_ktiled, compute_dtype=compute_dtype)
        dim_sem = ("parallel", "parallel", "arbitrary")
    else:
        grid = (B_pad // tile_b, R_pad // tile_n)
        in_specs = [
            pl.BlockSpec((tile_b, K_pad), lambda i, j: (i, 0)),       # x tile
            pl.BlockSpec((tile_n, K_pad), lambda i, j: (j, 0)),       # W tile
            pl.BlockSpec((1, tile_n), lambda i, j: (0, j)),           # bias
        ]
        out_specs = pl.BlockSpec((tile_b, tile_n), lambda i, j: (i, j))
        scratch = []
        kernel = functools.partial(_lsm_kernel_direct, compute_dtype=compute_dtype)
        dim_sem = ("parallel", "parallel")

    out_p = pl.pallas_call(
        kernel,
        out_shape=jax.ShapeDtypeStruct((B_pad, R_pad), out_dtype),
        grid_spec=pltpu.PrefetchScalarGridSpec(
            num_scalar_prefetch=0,
            grid=grid,
            in_specs=in_specs,
            out_specs=out_specs,
            scratch_shapes=scratch,
        ),
        compiler_params=pltpu.CompilerParams(
            dimension_semantics=dim_sem,
            vmem_limit_bytes=vmem_limit,
        ),
        cost_estimate=cost,
    )(x_p, w_p, b_p)

    if B_pad == B and R_pad == R:
        return out_p
    return out_p[:B, :R]


if __name__ == "__main__":
    # Small shapes consistent with the module's forward.
    batch = 16
    input_size = 32
    reservoir_size = 64

    key = jax.random.PRNGKey(0)
    kx, kw, kb = jax.random.split(key, 3)

    # Deterministic parameter init (PyTorch nn.Linear-style uniform bound).
    bound = 1.0 / (input_size ** 0.5)
    x = jax.random.normal(kx, (batch, input_size), dtype=jnp.float32)
    W = jax.random.uniform(kw, (reservoir_size, input_size),
                           minval=-bound, maxval=bound, dtype=jnp.float32)
    b = jax.random.uniform(kb, (reservoir_size,),
                           minval=-bound, maxval=bound, dtype=jnp.float32)

    y = liquid_state_machine(x, W, b)
    jax.block_until_ready(y)

    # Reference matching the in-kernel numerics (bf16 operands, f32 accumulate).
    x_bf = x.astype(jnp.bfloat16).astype(jnp.float32)
    W_bf = W.astype(jnp.bfloat16).astype(jnp.float32)
    y_ref_bf16 = jnp.tanh(x_bf @ W_bf.T + b)
    # Pure-f32 PyTorch-equivalent reference (looser tolerance: bf16 MXU inputs).
    y_ref_f32 = jnp.tanh(x @ W.T + b)

    assert y.shape == (batch, reservoir_size)
    assert jnp.allclose(y, y_ref_bf16, atol=1e-4, rtol=1e-4), "mismatch vs bf16 reference"
    assert jnp.allclose(y, y_ref_f32, atol=3e-2, rtol=3e-2), "mismatch vs f32 reference"

    print("KERNEL_OK")
</pallas_src>

<mosaic_0001>
module attributes {stable_mosaic.version = 11 : i64} {
  func.func @_lsm_kernel_direct(%arg0: i32, %arg1: i32, %arg2: memref<8x32xf32, #tpu.memory_space<vmem>>, %arg3: memref<128x32xf32, #tpu.memory_space<vmem>>, %arg4: memref<1x128xf32, #tpu.memory_space<vmem>>, %arg5: memref<8x128xf32, #tpu.memory_space<vmem>>) attributes {dimension_semantics = [#tpu.dimension_semantics<parallel>, #tpu.dimension_semantics<parallel>], iteration_bounds = array<i64: 2, 1>, scalar_prefetch = 0 : i64, scratch_operands = 0 : i64, tpu.core_type = #tpu.core_type<tc>, window_params = [{transform_indices = @transform_0, window_bounds = array<i64: 8, 32>}, {transform_indices = @transform_1, window_bounds = array<i64: 128, 32>}, {transform_indices = @transform_2, window_bounds = array<i64: 1, 128>}, {transform_indices = @transform_3, window_bounds = array<i64: 8, 128>}]} {
    %c0 = arith.constant 0 : index
    %c0_0 = arith.constant 0 : index
    %0 = vector.load %arg2[%c0, %c0_0] : memref<8x32xf32, #tpu.memory_space<vmem>>, vector<8x32xf32>
    %c0_1 = arith.constant 0 : index
    %c0_2 = arith.constant 0 : index
    %1 = vector.load %arg3[%c0_1, %c0_2] : memref<128x32xf32, #tpu.memory_space<vmem>>, vector<128x32xf32>
    %2 = arith.truncf %0 : vector<8x32xf32> to vector<8x32xbf16>
    %3 = arith.truncf %1 : vector<128x32xf32> to vector<128x32xbf16>
    %cst = arith.constant dense<0.000000e+00> : vector<8x128xf32>
    %4 = tpu.matmul %2, %3, %cst {dimension_numbers = #tpu.dot_dimension_numbers<[1], [1], [0], [0], [0, 0, 1, 0], [], []>} : vector<8x32xbf16>, vector<128x32xbf16>, vector<8x128xf32> -> vector<8x128xf32>
    %c0_3 = arith.constant 0 : index
    %c0_4 = arith.constant 0 : index
    %5 = vector.load %arg4[%c0_3, %c0_4] : memref<1x128xf32, #tpu.memory_space<vmem>>, vector<1x128xf32>
    %6 = vector.broadcast %5 : vector<1x128xf32> to vector<8x128xf32>
    %7 = arith.addf %4, %6 : vector<8x128xf32>
    %8 = math.tanh %7 : vector<8x128xf32>
    %c0_5 = arith.constant 0 : index
    %c0_6 = arith.constant 0 : index
    %9 = vector.load %arg5[%c0_5, %c0_6] : memref<8x128xf32, #tpu.memory_space<vmem>>, vector<8x128xf32>
    tpu.vector_store %arg5[%c0_5, %c0_6], %8 {strides = array<i32>} : memref<8x128xf32, #tpu.memory_space<vmem>>, vector<8x128xf32>,
    return
  }
  func.func @transform_0(%arg0: i32, %arg1: i32) -> (i32, i32) {
    %c0_i32 = arith.constant 0 : i32
    %c0_i32_0 = arith.constant 0 : i32
    return %arg0, %c0_i32 : i32, i32
  }
  func.func @transform_1(%arg0: i32, %arg1: i32) -> (i32, i32) {
    %c0_i32 = arith.constant 0 : i32
    %c0_i32_0 = arith.constant 0 : i32
    return %arg1, %c0_i32 : i32, i32
  }
  func.func @transform_2(%arg0: i32, %arg1: i32) -> (i32, i32) {
    %c0_i32 = arith.constant 0 : i32
    %c0_i32_0 = arith.constant 0 : i32
    return %c0_i32, %arg1 : i32, i32
  }
  func.func @transform_3(%arg0: i32, %arg1: i32) -> (i32, i32) {
    %c0_i32 = arith.constant 0 : i32
    return %arg0, %arg1 : i32, i32
  }
}

</mosaic_0001>

<bundles_post_ra>
// kernel: tpu_custom_call.1
= control target key start
LH: loop header
LB: loop body
LE: loop exit
PB: predicated region body
PF: predicated region fallthrough
CT: control target
= control target key end

     0   :  { %8 = vsyncpa [#allocation3], 0  ;;  %s730_s0 = inlined_call_operand.vmem [shape: f32[16,32], index: 0, kind: input, shape index: {}]   ;;  %s731_s1 = inlined_call_operand.vmem [shape: f32[128,32], index: 1, kind: input, shape index: {}]   ;;  %s732_s2 = inlined_call_operand.vmem [shape: f32[1,128], index: 2, kind: input, shape index: {}]   ;;  %s733_s3 = inlined_call_operand.hbm [shape: f32[16,128], index: 3, kind: output, shape index: {}]  }
   0x1   :  { %10 = vsyncpa [#allocation3 + $0x1], 0  ;;  %s573_s12 = smov 0   ;;  %s575_s13 = smov 0  }
   0x2   :  { %s577_s14 = smov 0   ;;  %s579_s15 = smov 0  }
   0x3   :  { %s581_s16 = smov 0   ;;  %s583_s17 = smov 0  }
   0x4 LB: > { %s401_s18 = sadd.s32 4294967295, %s551_s17   ;;  %s402_s19 = sadd.s32 4294967294, %s551_s17   ;;  %s551_s17 = sphi %s583_s17, %s16_s17   ;;  %s547_s16 = sphi %s581_s16, %s740_s16   ;;  %s543_s15 = sphi %s579_s15, %s739_s15   ;;  %s539_s14 = sphi %s577_s14, %s738_s14   ;;  %s535_s13 = sphi %s575_s13, %s737_s13   ;;  %s531_s12 = sphi %s573_s12, %s736_s12  }
   0x5   : > { %s28_s20 = sadd.s32 1, %s547_s16  ;;  %s115_s21 = sadd.s32 1, %s539_s14 }
   0x6   : > { %p30_p0 = scmp.ge.s32.totalorder %s28_s20, 2  ;;  %p125_p1 = scmp.ne.s32.totalorder %s539_s14, %s535_s13 }
   0x7   : > { %p126_p2 = scmp.eq.s32.totalorder %s401_s18, 1  ;;  %p131_p3 = scmp.ne.s32.totalorder %s535_s13, %s531_s12 }
   0x8   : > { %s742_s20 = smov (%p30_p0, %s28_s20), 0  ;;  %p132_p5 = scmp.eq.s32.totalorder %s402_s19, 1 }
   0x9   : > { %p613_p4 = por %p126_p2, %p125_p1  ;;  %s110_s23 = ssub.s32 %s547_s16, %s742_s20 }
   0xa   : > { %p407_p6 = scmp.ge.s32.totalorder %s551_s17, 1  ;;  %p113_p7 = scmp.eq.s32.totalorder %s110_s23, 0 }
   0xb   : > { %p620_p8 = por %p132_p5, %p131_p3  ;;  %p172_p9 = scmp.lt.s32.totalorder %s551_s17, 3 }
   0xc   : > { %s626_s25 = scalar_select %p113_p7, %s539_s14, %s115_s21  }
   0xd   : > { %p173_p10 = pnand %p407_p6, %p172_p9 }
   0xe   : > { %p203_p11 = scmp.lt.s32.totalorder (!%p173_p10), %s543_s15, 1  ;;  %s200_s29 = sand.u32 (!%p173_p10), 1, %s535_s13  }
   0xf   : > { %176 = sbr.rel (%p173_p10) target bundleno = 225 (0xe1), region = 32  ;;  %s408_s5 = sshll.u32 (!%p173_p10), %s200_s29, 3 }
  0x10   : > { %s412_s6 = sshll.u32 (!%p173_p10), %s543_s15, 3  ;;  %s202_s10 = scalar_lea.vmem (!%p173_p10), [#allocation2], %s408_s5 }
  0x11   : > { %s301_s9 = scalar_lea.hbm (!%p173_p10), %s733_s3, %s412_s6  ;;  %s303_s11 = sshll.u32 (!%p173_p10), %s202_s10, 4  ;;  %s304_s11 = int_to_ptr.vmem [resolvable:$true] %s303_s11 }
  0x12   : > { %s305_s18 = sshll.u32 (!%p173_p10), %s301_s9, 4  ;;  %s290_s19 = scalar_lea.sflag (!%p173_p10), [#allocation3], %s200_s29  ;;  %s306_s18 = int_to_ptr.hbm [resolvable:$true] %s305_s18 }
  0x13   : > { %s493_s27 = scalar_lea.hbm (!%p173_p10), %s733_s3, 16 }
  0x14   : > { %v231_v0 = vld [vmem:[%s731_s1 + $0x70] sm:$0xff]  ;;  %v232_v1 = vld [vmem:[%s731_s1 + $0x78] sm:$0xff]  ;;  %vm246_vm0 = vcmask 261120   ;;  %v229_v3 = vld [vmem:[%s731_s1 + $0x60] sm:$0xff]  ;;  %s204_s21 = scalar_select %p203_p11, %s543_s15, 1 }
  0x15   : > { %v241_v2 = vpack.c.bf16 %v232_v1, %v231_v0  ;;  %v230_v4 = vld [vmem:[%s731_s1 + $0x68] sm:$0xff]  ;;  %v227_v8 = vld [vmem:[%s731_s1 + $0x50] sm:$0xff]  ;;  %v228_v9 = vld [vmem:[%s731_s1 + $0x58] sm:$0xff] }
  0x16   : > { %v240_v6 = vpack.c.bf16 %v230_v4, %v229_v3  ;;  %v239_v10 = vpack.c.bf16 %v228_v9, %v227_v8  ;;  %v225_v12 = vld [vmem:[%s731_s1 + $0x40] sm:$0xff]  ;;  %v226_v13 = vld [vmem:[%s731_s1 + $0x48] sm:$0xff]  ;;  %v223_v16 = vld [vmem:[%s731_s1 + $0x30] sm:$0xff]  ;;  %s409_s23 = sshll.u32 %s204_s21, 3  ;;  %s487_s21 = sshra.s32 %s306_s18, 4  ;;  %s488_s21 = int_to_ptr.hbm [resolvable:$true] %s487_s21 }
  0x17   : > { %v272_v5 = vsel %vm246_vm0, %v241_v2, 0  ;;  %v238_v14 = vpack.c.bf16 %v226_v13, %v225_v12  ;;  %v224_v17 = vld [vmem:[%s731_s1 + $0x38] sm:$0xff]  ;;  %v221_v20 = vld [vmem:[%s731_s1 + $0x20] sm:$0xff]  ;;  %v222_v21 = vld [vmem:[%s731_s1 + $0x28] sm:$0xff]  ;;  %s206_s28 = scalar_lea.vmem %s730_s0, %s409_s23  ;;  %s489_s15 = scalar_lea.hbm %s488_s21, 8 }
  0x18   : > { %274 = vmatpush.bf16.xpose.msra.mxu0 %v272_v5  ;;  %v269_v7 = vsel %vm246_vm0, %v240_v6, 0  ;;  %v266_v11 = vsel %vm246_vm0, %v239_v10, 0  ;;  %v237_v18 = vpack.c.bf16 %v224_v17, %v223_v16  ;;  %v236_v22 = vpack.c.bf16 %v222_v21, %v221_v20  ;;  %v219_v24 = vld [vmem:[%s731_s1 + $0x10] sm:$0xff]  ;;  %v220_v25 = vld [vmem:[%s731_s1 + $0x18] sm:$0xff]  ;;  %v217_v28 = vld [vmem:[%s731_s1] sm:$0xff]  ;;  %p490_p12 = scmp.ne.s32.totalorder %s488_s21, %s489_s15  ;;  %p494_p1 = scmp.lt.s32.totalorder %s488_s21, %s733_s3 }
  0x19   : > { %v263_v15 = vsel %vm246_vm0, %v238_v14, 0  ;;  %v235_v26 = vpack.c.bf16 %v220_v25, %v219_v24  ;;  %v218_v29 = vld [vmem:[%s731_s1 + $0x8] sm:$0xff]  ;;  %v216_v32 = vld [vmem:[%s206_s28] sm:$0xff]  ;;  %p495_p2 = scmp.lt.s32.totalorder %s493_s27, %s489_s15 }
  0x1a   : > { %v260_v19 = vsel %vm246_vm0, %v237_v18, 0  ;;  %v257_v23 = vsel %vm246_vm0, %v236_v22, 0  ;;  %v234_v30 = vpack.c.bf16 %v218_v29, %v217_v28  ;;  %v233_v33 = vpack.c.bf16 %v216_v32, %v216_v32  ;;  %v470_v34 = vld [vmem:[%s732_s2] ss:$0 sm:$0xff]  ;;  %p491_p13 = pnand %p490_p12, %p613_p4 }
  0x1b   : > { %v254_v27 = vsel %vm246_vm0, %v235_v26, 0  ;;  %p496_p3 = por %p495_p2, %p494_p1 }
  0x1c   : > { %v251_v31 = vsel %vm246_vm0, %v234_v30, 0  ;;  %p492_p0 = pneg %p491_p13 }
  0x1e   : > { %p497_p5 = pnand %p496_p3, %p492_p0 }
  0x20   : > { %275 = vmatpush.bf16.xpose.msra.mxu0 %v269_v7 }
  0x28   : > { %276 = vmatpush.bf16.xpose.msra.mxu0 %v266_v11 }
  0x30   : > { %277 = vmatpush.bf16.xpose.msra.mxu0 %v263_v15 }
  0x38   : > { %278 = vmatpush.bf16.xpose.msra.mxu0 %v260_v19 }
  0x40   : > { %279 = vmatpush.bf16.xpose.msra.mxu0 %v257_v23 }
  0x48   : > { %280 = vmatpush.bf16.xpose.msra.mxu0 %v254_v27 }
  0x50   : > { %281 = vmatpush.bf16.xpose.msra.mxu0 %v251_v31 }
  0x57   : > { %410 = vmatmul.msk.bf16.vlgmr.msra.gmra.mxu0 %vm246_vm0, %v233_v33 }
  0xd4   : > { %v283_v35 = vpop.f32.mrf.mxu0 }
  0xd5   : > { %v284_v36 = vadd.f32 %v470_v34, %v283_v35 }
  0xd7   : > { %471 = vtanh.f32 %v284_v36 }
  0xdc   : > { %v285_v37 = vpop.f32.mrf.mxu0 }
  0xdd   : > { %v472_v38 = vpop.eup %471 }
  0xde   : > { %288 = vst [vmem:[%s202_s10] sm:$0xff] %v472_v38 }
  0xdf   : > { %500 = shalt.err (!%p497_p5)
}
  0xe0   : > { %415 = dma.vmem_to_hbm [thread:$0]  (%p613_p4), %s304_s11, 128, %s306_s18, %s290_s19  }
  0xe1 PF: > { %p421_p6 = scmp.ge.s32.totalorder %s551_s17, 2  ;;  %s317_s29 = sand.u32 1, %s531_s12  }
  0xe2   : > { %s318_s4 = scalar_lea.sflag [#allocation3], %s317_s29 }
  0xe3   : > { %p418_p7 = pnand %p421_p6, %p620_p8 }
  0xe5   : > { %p419_p9 = pneg %p418_p7 }
  0xe7   : > { %526 = dma.done.wait (%p419_p9), %s318_s4, 128  }
  0xe8   : > { %528 = vsyncadd (%p419_p9), %s318_s4, 4294967168  ;;  %s16_s17 = sadd.s32 1, %s551_s17   ;;  %s736_s12 = smov %s535_s13 }
  0xe9   : > { %p13_p10 = scmp.ge.s32.totalorder %s16_s17, 4   ;;  %s737_s13 = smov %s539_s14 }
  0xea   : > { %s738_s14 = smov %s626_s25  ;;  %s739_s15 = smov %s547_s16 }
  0xeb   : > { %s740_s16 = smov %s742_s20  ;;  %15 = sbr.rel (!%p13_p10) target bundleno = 4 (0x4), region = 73 }
  0xf0   :  { %324 = vsyncpa [#allocation3], 1 }
  0xf1   :  { %326 = vsyncpa [#allocation3 + $0x1], 1 }

</bundles_post_ra>
